<compile_context>
chip_gen: v7x
topology: tpu7x:2x2x1
jax: 0.10.0
libtpu: 0.0.40
codegen_flags: <defaults>
</compile_context>

<pallas_src>
import jax
import jax.numpy as jnp
from jax import lax
from jax.experimental import pallas as pl
from jax.experimental.pallas import tpu as pltpu


def _round_up(v, m):
    return ((v + m - 1) // m) * m


def _cdiv(a, b):
    return -(-a // b)


def msgnorm_kernel(scale_ref, x_ref, msg_ref, out_ref):
    # scale_ref: SMEM (1,) scalar; x_ref/msg_ref/out_ref: VMEM (tm, D_pad) tiles.
    msg = msg_ref[...]
    x = x_ref[...]

    # f32 accumulation of the per-row sums of squares (lane reduction -> XLU).
    msg_sq = jnp.sum(jnp.square(msg.astype(jnp.float32)), axis=-1, keepdims=True)
    x_sq = jnp.sum(jnp.square(x.astype(jnp.float32)), axis=-1, keepdims=True)

    # coeff = ||x||_2 / max(||msg||_2, 1e-12) * msg_scale, computed as
    # sqrt(x_sq) * rsqrt(max(msg_sq, 1e-24)) * scale  (mathematically identical
    # clamp; exact rsqrt, not approx, to preserve 1e-5 parity with PyTorch).
    coeff = (jnp.sqrt(x_sq)
             * lax.rsqrt(jnp.maximum(msg_sq, jnp.float32(1e-24)))
             * scale_ref[0])                         # (tm, 1) f32

    # Single broadcast multiply over the tile, in the native input dtype.
    out_ref[...] = (msg * coeff.astype(msg.dtype)).astype(out_ref.dtype)


def _plan_tiles(n, d, itemsize, vmem_budget_bytes, tm_cap):
    """Pick (tm, n_pad, d_pad, num_blocks) for a lane-dense, VMEM-fitting tiling."""
    d_pad = _round_up(max(d, 1), 128)          # lane-dense last dim
    n_pad8 = _round_up(max(n, 1), 8)           # sublane-aligned row count

    # 3 arrays (x, msg, out) x 2 pipeline buffers per tm rows of d_pad elements.
    bytes_per_row = 6 * d_pad * itemsize
    tm_budget = max(8, min(tm_cap, vmem_budget_bytes // bytes_per_row))
    tm_budget = (tm_budget // 8) * 8

    num_blocks = max(1, _cdiv(n_pad8, tm_budget))
    # Prefer >= 2 grid steps so v7x megacore can split the parallel axis.
    if num_blocks == 1 and n_pad8 >= 16:
        num_blocks = 2

    tm = _round_up(_cdiv(n_pad8, num_blocks), 8)
    n_pad = tm * num_blocks
    return tm, n_pad, d_pad, num_blocks


def msg_norm(x, msg, msg_scale, *, vmem_budget_bytes=8 << 20, tm_cap=4096):
    """x: (N, D), msg: (N, D), msg_scale: (1,) float32.

    vmem_budget_bytes / tm_cap are per-generation tunables:
      v5e (16 MiB default scoped VMEM): keep budget <= ~12 MiB.
      v6e (32 MiB default scoped VMEM): up to ~24 MiB.
      v7x (64 MiB physical VMEM): ~24-28 MiB, and raise vmem_limit_bytes if larger.
    The 8 MiB default is safe on every generation at default scoped limits.
    """
    N, D = x.shape
    assert msg.shape == (N, D)

    itemsize = max(jnp.dtype(x.dtype).itemsize, jnp.dtype(msg.dtype).itemsize)
    tm, n_pad, d_pad, num_blocks = _plan_tiles(
        N, D, itemsize, vmem_budget_bytes, tm_cap)

    needs_pad = (n_pad != N) or (d_pad != D)
    if needs_pad:
        # Zero padding: padded rows/cols contribute 0 to both norms; padded rows
        # yield coeff = 0 * rsqrt(clamped) = 0 exactly (no NaN), sliced off below.
        x = jnp.pad(x, ((0, n_pad - N), (0, d_pad - D)))
        msg = jnp.pad(msg, ((0, n_pad - N), (0, d_pad - D)))

    scale = jnp.asarray(msg_scale, dtype=jnp.float32).reshape((1,))

    out = pl.pallas_call(
        msgnorm_kernel,
        out_shape=jax.ShapeDtypeStruct((n_pad, d_pad), msg.dtype),
        grid=(num_blocks,),
        in_specs=[
            pl.BlockSpec(memory_space=pltpu.SMEM),            # msg_scale scalar
            pl.BlockSpec((tm, d_pad), lambda i: (i, 0)),      # x row-tile
            pl.BlockSpec((tm, d_pad), lambda i: (i, 0)),      # msg row-tile
        ],
        out_specs=pl.BlockSpec((tm, d_pad), lambda i: (i, 0)),
        compiler_params=pltpu.CompilerParams(
            dimension_semantics=("parallel",)),
    )(scale, x, msg)

    if needs_pad:
        out = out[:N, :D]
    return out


def msg_norm_ref(x, msg, msg_scale):
    # Pure-JAX reference mirroring the PyTorch forward.
    msg_n = jnp.sqrt(jnp.sum(msg * msg, axis=1, keepdims=True))
    msg_unit = msg / jnp.maximum(msg_n, 1e-12)
    x_norm = jnp.sqrt(jnp.sum(x * x, axis=1, keepdims=True))
    return msg_unit * x_norm * msg_scale[0]


if __name__ == "__main__":
    # Deterministic parameter init, matching torch.nn.Parameter(torch.Tensor([1.0])).
    msg_scale = jnp.array([1.0], dtype=jnp.float32)

    key = jax.random.PRNGKey(0)
    kx, km = jax.random.split(key)
    N, D = 16, 32  # small node-feature shapes consistent with the GCN layer
    x = jax.random.normal(kx, (N, D), dtype=jnp.float32)
    msg = jax.random.normal(km, (N, D), dtype=jnp.float32)

    out = msg_norm(x, msg, msg_scale)
    out = jax.block_until_ready(out)

    ref = msg_norm_ref(x, msg, msg_scale)
    assert out.shape == (N, D)
    assert jnp.allclose(out, ref, atol=1e-5, rtol=1e-5)

    print("KERNEL_OK")
</pallas_src>

<mosaic_0001>
module attributes {stable_mosaic.version = 11 : i64} {
  func.func @msgnorm_kernel(%arg0: i32, %arg1: memref<1xf32, #tpu.memory_space<smem>>, %arg2: memref<8x128xf32, #tpu.memory_space<vmem>>, %arg3: memref<8x128xf32, #tpu.memory_space<vmem>>, %arg4: memref<8x128xf32, #tpu.memory_space<vmem>>) attributes {dimension_semantics = [#tpu.dimension_semantics<parallel>], iteration_bounds = array<i64: 2>, scalar_prefetch = 0 : i64, scratch_operands = 0 : i64, tpu.core_type = #tpu.core_type<tc>, window_params = [{transform_indices = @transform_0, window_bounds = array<i64: 1>}, {transform_indices = @transform_1, window_bounds = array<i64: 8, 128>}, {transform_indices = @transform_2, window_bounds = array<i64: 8, 128>}, {transform_indices = @transform_3, window_bounds = array<i64: 8, 128>}]} {
    %c0 = arith.constant 0 : index
    %c0_0 = arith.constant 0 : index
    %0 = vector.load %arg3[%c0, %c0_0] : memref<8x128xf32, #tpu.memory_space<vmem>>, vector<8x128xf32>
    %c0_1 = arith.constant 0 : index
    %c0_2 = arith.constant 0 : index
    %1 = vector.load %arg2[%c0_1, %c0_2] : memref<8x128xf32, #tpu.memory_space<vmem>>, vector<8x128xf32>
    %2 = arith.mulf %0, %0 : vector<8x128xf32>
    %cst = arith.constant dense<0.000000e+00> : vector<8xf32>
    %3 = vector.multi_reduction <add>, %2, %cst [1] : vector<8x128xf32> to vector<8xf32>
    %4 = vector.shape_cast %3 : vector<8xf32> to vector<8x1xf32>
    %5 = arith.mulf %1, %1 : vector<8x128xf32>
    %cst_3 = arith.constant dense<0.000000e+00> : vector<8xf32>
    %6 = vector.multi_reduction <add>, %5, %cst_3 [1] : vector<8x128xf32> to vector<8xf32>
    %7 = vector.shape_cast %6 : vector<8xf32> to vector<8x1xf32>
    %8 = math.sqrt %7 : vector<8x1xf32>
    %cst_4 = arith.constant 1.000000e-24 : f32
    %9 = vector.broadcast %cst_4 : f32 to vector<8x1xf32>
    %10 = arith.maximumf %4, %9 : vector<8x1xf32>
    %11 = math.rsqrt %10 : vector<8x1xf32>
    %12 = arith.mulf %8, %11 : vector<8x1xf32>
    %c0_5 = arith.constant 0 : index
    %13 = memref.load %arg1[%c0_5] : memref<1xf32, #tpu.memory_space<smem>>
    %14 = vector.broadcast %13 : f32 to vector<8x1xf32>
    %15 = arith.mulf %12, %14 : vector<8x1xf32>
    %16 = vector.broadcast %15 : vector<8x1xf32> to vector<8x128xf32>
    %17 = arith.mulf %0, %16 : vector<8x128xf32>
    %c0_6 = arith.constant 0 : index
    %c0_7 = arith.constant 0 : index
    %18 = vector.load %arg4[%c0_6, %c0_7] : memref<8x128xf32, #tpu.memory_space<vmem>>, vector<8x128xf32>
    tpu.vector_store %arg4[%c0_6, %c0_7], %17 {strides = array<i32>} : memref<8x128xf32, #tpu.memory_space<vmem>>, vector<8x128xf32>,
    return
  }
  func.func @transform_0(%arg0: i32) -> i32 {
    %c0_i32 = arith.constant 0 : i32
    %c0_i32_0 = arith.constant 0 : i32
    return %c0_i32 : i32
  }
  func.func @transform_1(%arg0: i32) -> (i32, i32) {
    %c0_i32 = arith.constant 0 : i32
    %c0_i32_0 = arith.constant 0 : i32
    return %arg0, %c0_i32 : i32, i32
  }
  func.func @transform_2(%arg0: i32) -> (i32, i32) {
    %c0_i32 = arith.constant 0 : i32
    %c0_i32_0 = arith.constant 0 : i32
    return %arg0, %c0_i32 : i32, i32
  }
  func.func @transform_3(%arg0: i32) -> (i32, i32) {
    %c0_i32 = arith.constant 0 : i32
    %c0_i32_0 = arith.constant 0 : i32
    return %arg0, %c0_i32 : i32, i32
  }
}

</mosaic_0001>

<bundles_post_ra>
// kernel: tpu_custom_call.1
= control target key start
LH: loop header
LB: loop body
LE: loop exit
PB: predicated region body
PF: predicated region fallthrough
CT: control target
= control target key end

     0   :  { %s796_s0 = inlined_call_operand.<no memory space> [shape: f32[1], index: 0, kind: input, shape index: {}]   ;;  %s797_s1 = inlined_call_operand.hbm [shape: f32[16,128], index: 1, kind: input, shape index: {}]   ;;  %s798_s2 = inlined_call_operand.hbm [shape: f32[16,128], index: 2, kind: input, shape index: {}]   ;;  %s799_s3 = inlined_call_operand.hbm [shape: f32[16,128], index: 3, kind: output, shape index: {}]  }
   0x1   :  { %8 = sst [smem:[#allocation2]] %s796_s0 }
   0x2   :  { %9 = vsyncpa [#allocation4], 0 }
   0x3   :  { %11 = vsyncpa [#allocation4 + $0x1], 0 }
   0x4   :  { %12 = vsyncpa [#allocation7], 0 }
   0x5   :  { %14 = vsyncpa [#allocation7 + $0x1], 0 }
   0x6   :  { %15 = vsyncpa [#allocation5], 0 }
   0x7   :  { %17 = vsyncpa [#allocation5 + $0x1], 0  ;;  %s582_s14 = smov 0   ;;  %s584_s15 = smov 0  }
   0x8   :  { %s586_s16 = smov 0   ;;  %s588_s17 = smov 0  }
   0x9 LB: > { %s603_s0 = sadd.s32 4294967295, %s554_s17   ;;  %s354_s18 = sadd.s32 4294967294, %s554_s17   ;;  %s554_s17 = sphi %s588_s17, %s818_s17   ;;  %s550_s16 = sphi %s586_s16, %s817_s16   ;;  %s546_s15 = sphi %s584_s15, %s816_s15   ;;  %s542_s14 = sphi %s582_s14, %s815_s14  }
   0xa   : > { %s607_s19 = sadd.s32 1, %s554_s17   ;;  %s51_s20 = sadd.s32 1, %s550_s16 }
   0xb   : > { %s48_s21 = ssub.s32 %s554_s17, %s607_s19  ;;  %p58_p0 = scmp.ne.s32.totalorder %s550_s16, %s546_s15 }
   0xc   : > { %p49_p1 = scmp.eq.s32.totalorder %s48_s21, 0  ;;  %p59_p2 = scmp.eq.s32.totalorder %s554_s17, 0 }
   0xd   : > { %p64_p3 = scmp.ne.s32.totalorder %s546_s15, %s542_s14  ;;  %p65_p4 = scmp.eq.s32.totalorder %s603_s0, 0 }
   0xe   : > { %s619_s22 = scalar_select %p49_p1, %s550_s16, %s51_s20  }
   0xf   : > { %p621_p5 = por %p59_p2, %p58_p0  ;;  %p625_p6 = por %p65_p4, %p64_p3 }
  0x10   : > { %p114_p7 = scmp.eq.s32.totalorder %s603_s0, 1  ;;  %p120_p8 = scmp.eq.s32.totalorder %s354_s18, 1 }
  0x11   : > { %s803_s24 = scalar_select %p625_p6, 1, 0 }
  0x12   : > { %p386_p10 = scmp.lt.s32.totalorder %s554_s17, 2  ;;  %p632_p11 = por %p114_p7, %p58_p0 }
  0x13   : > { %p636_p12 = por %p120_p8, %p64_p3  ;;  %s641_s27 = sand.u32 1, %s550_s16  }
  0x14   : > { %s804_s25 = scalar_select %p632_p11, 1, 0 }
  0x15   : > { %s805_s26 = scalar_select %p636_p12, 1, 0 }
  0x16   : > { %s358_s28 = sshll.u32 %s554_s17, 7  ;;  %s357_s29 = sshll.u32 %s641_s27, 3 }
  0x17   : > { %s650_s5 = scalar_lea.hbm %s797_s1, %s358_s28  ;;  %s147_s6 = scalar_lea.vmem [#allocation3], %s357_s29 }
  0x18   : > { %s154_s7 = sshll.u32 %s147_s6, 4  ;;  %p656_p13 = pnand %p386_p10, %p621_p5  ;;  %s660_s7 = int_to_ptr.vmem [resolvable:$true] %s154_s7 }
  0x19   : > { %s144_s9 = scalar_lea.sflag [#allocation4], %s641_s27  ;;  %s424_s10 = scalar_lea.hbm %s650_s5, 128 }
  0x1a   : > { %p425_p2 = scmp.ne.s32.totalorder %s650_s5, %s424_s10  ;;  %p426_p3 = pneg %p656_p13 }
  0x1b   : > { %s429_s13 = scalar_lea.hbm %s797_s1, 256  ;;  %p430_p5 = scmp.lt.u32.totalorder %s650_s5, %s797_s1 }
  0x1c   : > { %p427_p4 = pnand %p426_p3, %p425_p2  ;;  %p431_p8 = scmp.lt.u32.totalorder %s429_s13, %s424_s10 }
  0x1d   : > { %p433_p9 = scmp.lt.u32.totalorder %s424_s10, %s650_s5 }
  0x1e   : > { %p428_p7 = pneg %p427_p4  ;;  %p432_p10 = por %p431_p8, %p430_p5 }
  0x20   : > { %p434_p0 = por %p433_p9, %p432_p10 }
  0x22   : > { %p435_p1 = pnand %p434_p0, %p428_p7 }
  0x24   : > { %438 = shalt.err (!%p435_p1)
}
  0x25   : > { %s439_s21 = scalar_lea.vmem %s660_s7, 128  ;;  %s556_s23 = smov [#allocation3]  }
  0x26   : > { %p440_p2 = scmp.ne.s32.totalorder %s660_s7, %s439_s21  ;;  %s444_s30 = sshll.u32 %s556_s23, 4  ;;  %s445_s30 = int_to_ptr.vmem [resolvable:$false] %s444_s30 }
  0x27   : > { %s446_s4 = scalar_lea.vmem %s445_s30, 256  ;;  %p447_p11 = scmp.lt.s32.totalorder %s660_s7, %s445_s30 }
  0x28   : > { %p442_p4 = pnand %p440_p2, %p426_p3  ;;  %p448_p5 = scmp.lt.s32.totalorder %s446_s4, %s439_s21 }
  0x2a   : > { %p443_p12 = pneg %p442_p4  ;;  %p449_p8 = por %p448_p5, %p447_p11 }
  0x2c   : > { %p450_p9 = pnand %p449_p8, %p443_p12 }
  0x2e   : > { %453 = shalt.err (!%p450_p9)
}
  0x2f   : > { %378 = dma.hbm_to_vmem [thread:$0]  (!%p656_p13), %s650_s5, 128, %s660_s7, %s144_s9  }
  0x30   : > { %p807_p0 = scmp.lt.s32.totalorder %s554_s17, 3  ;;  %p808_p1 = scmp.ge.s32.totalorder %s554_s17, 1 }
  0x31   : > { %s703_s12 = scalar_lea.hbm %s798_s2, %s358_s28  ;;  %s165_s13 = scalar_lea.vmem [#allocation6], %s357_s29 }
  0x32   : > { %p694_p7 = pnand %p808_p1, %p807_p0  ;;  %s172_s18 = sshll.u32 %s165_s13, 4  ;;  %s173_s18 = int_to_ptr.vmem [resolvable:$true] %s172_s18 }
  0x33   : > { %s162_s5 = scalar_lea.sflag [#allocation7], %s641_s27  ;;  %s454_s7 = scalar_lea.hbm %s703_s12, 128 }
  0x34   : > { %s809_s6 = scalar_select %p694_p7, 1, 0 }
  0x35   : > { %p455_p11 = scmp.ne.s32.totalorder %s703_s12, %s454_s7  ;;  %s459_s28 = scalar_lea.hbm %s798_s2, 256 }
  0x36   : > { %p460_p2 = scmp.lt.u32.totalorder %s703_s12, %s798_s2  ;;  %p461_p4 = scmp.lt.u32.totalorder %s459_s28, %s454_s7 }
  0x37   : > { %p457_p12 = pnand %p455_p11, %p426_p3  ;;  %p463_p8 = scmp.lt.u32.totalorder %s454_s7, %s703_s12 }
  0x38   : > { %p462_p5 = por %p461_p4, %p460_p2 }
  0x39   : > { %p458_p10 = pneg %p457_p12 }
  0x3a   : > { %p464_p9 = por %p463_p8, %p462_p5 }
  0x3c   : > { %p465_p0 = pnand %p464_p9, %p458_p10 }
  0x3e   : > { %468 = shalt.err (!%p465_p0)
}
  0x3f   : > { %s469_s27 = scalar_lea.vmem %s173_s18, 128  ;;  %s557_s29 = smov [#allocation6]  }
  0x40   : > { %p470_p1 = scmp.ne.s32.totalorder %s173_s18, %s469_s27  ;;  %s474_s30 = sshll.u32 %s557_s29, 4  ;;  %s475_s30 = int_to_ptr.vmem [resolvable:$false] %s474_s30 }
  0x41   : > { %s476_s4 = scalar_lea.vmem %s475_s30, 256  ;;  %p477_p6 = scmp.lt.s32.totalorder %s173_s18, %s475_s30 }
  0x42   : > { %p472_p11 = pnand %p470_p1, %p426_p3  ;;  %p478_p7 = scmp.lt.s32.totalorder %s476_s4, %s469_s27 }
  0x44   : > { %p473_p12 = pneg %p472_p11  ;;  %p479_p2 = por %p478_p7, %p477_p6 }
  0x46   : > { %p480_p4 = pnand %p479_p2, %p473_p12 }
  0x48   : > { %483 = shalt.err (!%p480_p4)
}
  0x49   : > { %381 = dma.hbm_to_vmem [thread:$0]  (!%p656_p13), %s703_s12, 128, %s173_s18, %s162_s5  }
  0x4a   : > { %p810_p10 = scmp.ne.s32.totalorder %s809_s6, 0 }
  0x4b   : > { %s730_s10 = sand.u32 (!%p810_p10), 1, %s546_s15   ;;  %p811_p6 = scmp.ne.s32.totalorder (!%p810_p10), %s803_s24, 0 }
  0x4c   : > { %181 = sbr.rel (%p810_p10) target bundleno = 268 (0x10c), region = 32  ;;  %s733_s11 = sshll.u32 (!%p810_p10), %s730_s10, 3 }
  0x4d   : > { %s184_s13 = scalar_lea.sflag (!%p810_p10), [#allocation4], %s730_s10  ;;  %s187_s7 = scalar_lea.vmem (!%p810_p10), [#allocation3], %s733_s11 }
  0x53   : > { %529 = dma.done.wait (%p811_p6), %s184_s13, 128  }
  0x54   : > { %531 = vsyncadd (%p811_p6), %s184_s13, 4294967168  ;;  %s193_s8 = scalar_lea.sflag [#allocation7], %s730_s10  ;;  %s196_s6 = scalar_lea.vmem [#allocation6], %s733_s11 }
  0x55   : > { %533 = dma.done.wait (%p811_p6), %s193_s8, 128  }
  0x56   : > { %535 = vsyncadd (%p811_p6), %s193_s8, 4294967168  ;;  %v225_v0 = vld [vmem:[%s187_s7] sm:$0xff]  ;;  %v224_v1 = vld [vmem:[%s196_s6] sm:$0xff]  ;;  %s242_s12 = sld [smem:[#allocation2]]  ;;  %s366_s24 = sshll.u32 %s603_s0, 7 }
  0x57   : > { %v229_v2 = vmul.f32 %v225_v0, %v225_v0  ;;  %v226_v3 = vmul.f32 %v224_v1, %v224_v1  ;;  %s223_s18 = scalar_lea.vmem [#allocation8], %s733_s11  ;;  %s752_s28 = scalar_lea.hbm %s799_s3, %s366_s24 }
  0x58   : > { %s261_s5 = sshll.u32 %s223_s18, 4  ;;  %s248_s21 = scalar_lea.sflag [#allocation5], %s730_s10  ;;  %s754_s5 = int_to_ptr.vmem [resolvable:$true] %s261_s5 }
  0x59   : > { %230 = vadd.xlane.f32.xlu0 %v229_v2  ;;  %s484_s23 = scalar_lea.vmem %s754_s5, 128  ;;  %p812_p3 = scmp.ne.s32.totalorder %s804_s25, 0 }
  0x5a   : > { %p485_p13 = scmp.ne.s32.totalorder %s754_s5, %s484_s23  ;;  %s558_s0 = smov [#allocation8]  }
  0x5b   : > { %s488_s27 = sshll.u32 %s558_s0, 4  ;;  %s489_s27 = int_to_ptr.vmem [resolvable:$false] %s488_s27 }
  0x5c   : > { %v243_v12 = vstv %s242_s12  ;;  %p486_p7 = pnand %p485_p13, %p812_p3  ;;  %s490_s29 = scalar_lea.vmem %s489_s27, 256 }
  0x5d   : > { %227 = vadd.xlane.f32.xlu0 %v226_v3  ;;  %p491_p8 = scmp.lt.s32.totalorder %s754_s5, %s489_s27  ;;  %p492_p9 = scmp.lt.s32.totalorder %s490_s29, %s484_s23 }
  0x5e   : > { %p487_p5 = pneg %p486_p7 }
  0x5f   : > { %p493_p0 = por %p492_p9, %p491_p8 }
  0x61   : > { %p494_p1 = pnand %p493_p0, %p487_p5 }
  0xe6   : > { %v231_v4 = vpop.xlane.xlu0 %230 }
  0xe7   : > { %420 = vrsqrt.f32 %v231_v4  ;;  %vm234_vm0 = vcmp.eq.f32.partialorder %v231_v4, inf  ;;  %v237_v10 = vand.u32 2147483648, %v231_v4  ;;  %vm236_vm1 = vcmp.eq.f32.partialorder %v231_v4, 0.0 }
  0xea   : > { %v228_v5 = vpop.xlane.xlu0 %227 }
  0xeb   : > { %v239_v6 = vmax.f32 %v228_v5, 1e-24 }
  0xed   : > { %422 = vrsqrt.f32 %v239_v6 }
  0xf1   : > { %v421_v7 = vpop.eup %420 }
  0xf2   : > { %v233_v8 = vmul.f32 %v421_v7, %v231_v4 }
  0xf4   : > { %v235_v9 = vsel %vm234_vm0, %v231_v4, %v233_v8 }
  0xf5   : > { %v238_v13 = vsel %vm236_vm1, %v237_v10, %v235_v9 }
  0xf7   : > { %v423_v11 = vpop.eup %422 }
  0xf8   : > { %v241_v14 = vmul.f32 %v423_v11, %v238_v13 }
  0xfa   : > { %v244_v15 = vmul.f32 %v243_v12, %v241_v14 }
  0xfc   : > { %v245_v16 = vmul.f32 %v244_v15, %v224_v1 }
  0xfe   : > { %246 = vst [vmem:[%s223_s18] sm:$0xff] %v245_v16 }
  0xff   : > { %497 = shalt.err (!%p494_p1)
}
 0x100   : > { %s498_s30 = scalar_lea.hbm %s752_s28, 128  ;;  %s502_s11 = scalar_lea.hbm %s799_s3, 256 }
 0x101   : > { %p499_p11 = scmp.ne.s32.totalorder %s752_s28, %s498_s30  ;;  %p503_p4 = scmp.lt.u32.totalorder %s752_s28, %s799_s3 }
 0x102   : > { %p504_p10 = scmp.lt.u32.totalorder %s502_s11, %s498_s30  ;;  %p506_p13 = scmp.lt.u32.totalorder %s498_s30, %s752_s28 }
 0x103   : > { %p500_p12 = pnand %p499_p11, %p812_p3 }
 0x104   : > { %p505_p6 = por %p504_p10, %p503_p4 }
 0x105   : > { %p501_p2 = pneg %p500_p12 }
 0x106   : > { %p507_p7 = por %p506_p13, %p505_p6 }
 0x108   : > { %p508_p5 = pnand %p507_p7, %p501_p2 }
 0x10a   : > { %511 = shalt.err (!%p508_p5)
}
 0x10b   : > { %373 = dma.vmem_to_hbm [thread:$0]  (%p812_p3), %s754_s5, 128, %s752_s28, %s248_s21  }
 0x10c PF: > { %s273_s8 = sand.u32 1, %s542_s14   ;;  %p813_p8 = scmp.ne.s32.totalorder %s805_s26, 0 }
 0x10d   : > { %p814_p9 = scmp.ge.s32.totalorder %s554_s17, 2  ;;  %s274_s6 = scalar_lea.sflag [#allocation5], %s273_s8 }
 0x10f   : > { %p383_p0 = pnand %p814_p9, %p813_p8 }
 0x111   : > { %537 = dma.done.wait (!%p383_p0), %s274_s6, 128  }
 0x112   : > { %539 = vsyncadd (!%p383_p0), %s274_s6, 4294967168  ;;  %p20_p1 = scmp.ge.s32.totalorder %s607_s19, 4   ;;  %s815_s14 = smov %s546_s15 }
 0x113   : > { %s816_s15 = smov %s550_s16  ;;  %s817_s16 = smov %s619_s22 }
 0x114   : > { %s818_s17 = smov %s607_s19  ;;  %22 = sbr.rel (!%p20_p1) target bundleno = 9 (0x9), region = 90 }
 0x11b   :  { %279 = vsyncpa [#allocation4], 1 }
 0x11c   :  { %281 = vsyncpa [#allocation4 + $0x1], 1 }
 0x11d   :  { %282 = vsyncpa [#allocation7], 1 }
 0x11e   :  { %284 = vsyncpa [#allocation7 + $0x1], 1 }
 0x11f   :  { %285 = vsyncpa [#allocation5], 1 }
 0x120   :  { %287 = vsyncpa [#allocation5 + $0x1], 1 }

</bundles_post_ra>
